<compile_context>
chip_gen: v7x
topology: tpu7x:2x2x1
jax: 0.10.0
libtpu: 0.0.40
codegen_flags: <defaults>
</compile_context>

<pallas_src>
import jax
import jax.numpy as jnp
from jax.experimental import pallas as pl
from jax.experimental.pallas import tpu as pltpu


def _gating_kernel(x_ref, g_ref, wx_ref, gb_ref, img_ref, gate_ref):
    # x_ref  : (TT, B, C)  current time-tile of x (streamed)
    # g_ref  : (B, C)      mean over time of grid_img_features (VMEM-resident)
    # wx_ref : (1, C)      x-half of fc_img.weight (VMEM-resident)
    # gb_ref : (B, 1)      g_mean @ wg_half + bias, precomputed per batch
    # img_ref: (TT, B, C)  gate * g
    # gate_ref:(TT, B, 1)  sigmoid(Linear(2C->1)(cat([x, g])))
    x = x_ref[...].astype(jnp.float32)                     # (TT, B, C)
    g = g_ref[...].astype(jnp.float32)                     # (B, C)
    wx = wx_ref[...].astype(jnp.float32)                   # (1, C)
    gb = gb_ref[...].astype(jnp.float32)                   # (B, 1)

    # Linear(2C->1)(cat([x, g])) == sum_c x*wx + (sum_c g*wg + bias)
    logit = jnp.sum(x * wx[None], axis=-1, keepdims=True) + gb[None]  # (TT,B,1)
    gate = jax.nn.sigmoid(logit)                                      # (TT,B,1)

    gate_ref[...] = gate.astype(gate_ref.dtype)
    img_ref[...] = (gate * g[None]).astype(img_ref.dtype)


def _pick_time_tile(t, b, itemsize=4, vmem_budget=12 * 1024 * 1024):
    """Pick the time-tile TT so the 3 double-buffered (TT, B, C) streams
    (x in, img out, gate out -- gate's minor dim pads to 128 lanes in VMEM)
    stay within a budget that is safe under every generation's scoped-VMEM
    default."""
    padded_b = ((b + 7) // 8) * 8
    per_row_bytes = padded_b * 128 * itemsize          # one t-row, lane-padded
    tt = max(1, vmem_budget // (6 * per_row_bytes))    # 3 streams x 2 buffers
    tt = min(tt, 512, t)
    # Keep >= 2 grid steps for larger T so the "parallel" axis can shard
    # across v7x's two TensorCores.
    if t >= 64 and pl.cdiv(t, tt) == 1:
        tt = (t + 1) // 2
    return tt


def gating_mechanism(x, grid_img_features, weight, bias):
    """
    x                 : (T, B, C)  float32
    grid_img_features : (Tg, B, C) float32
    weight            : (1, 2C)    float32  (fc_img.weight, PyTorch layout)
    bias              : (1,)       float32  (fc_img.bias)
    returns (img_features (T, B, C), gate (T, B, 1))
    """
    t, b, c = x.shape
    assert weight.shape == (1, 2 * c)
    assert bias.shape == (1,)

    # Cheap O(B*C) glue in plain JAX: time-mean of the grid features, the
    # x-half of the weight, and the g-half folded with the bias.
    g_mean = jnp.mean(grid_img_features, axis=0).astype(jnp.float32)  # (B, C)
    wx = weight[:, :c].astype(jnp.float32)                            # (1, C)
    wg = weight[:, c:].astype(jnp.float32)                            # (1, C)
    gb = (jnp.sum(g_mean * wg, axis=-1, keepdims=True)
          + bias.astype(jnp.float32).reshape(1, 1))                   # (B, 1)

    tt = _pick_time_tile(t, b, jnp.dtype(x.dtype).itemsize)
    grid = (pl.cdiv(t, tt),)

    img, gate = pl.pallas_call(
        _gating_kernel,
        out_shape=(
            jax.ShapeDtypeStruct((t, b, c), x.dtype),
            jax.ShapeDtypeStruct((t, b, 1), x.dtype),
        ),
        grid_spec=pltpu.PrefetchScalarGridSpec(
            num_scalar_prefetch=0,
            grid=grid,
            in_specs=[
                pl.BlockSpec((tt, b, c), lambda i: (i, 0, 0)),  # x tile (streamed)
                pl.BlockSpec((b, c), lambda i: (0, 0)),         # g_mean (resident)
                pl.BlockSpec((1, c), lambda i: (0, 0)),         # wx (resident)
                pl.BlockSpec((b, 1), lambda i: (0, 0)),         # gb (resident)
            ],
            out_specs=[
                pl.BlockSpec((tt, b, c), lambda i: (i, 0, 0)),  # img_features
                pl.BlockSpec((tt, b, 1), lambda i: (i, 0, 0)),  # gate
            ],
        ),
        compiler_params=pltpu.CompilerParams(
            dimension_semantics=("parallel",)),
    )(x, g_mean, wx, gb)

    return img, gate


def _init_params(key, c):
    # fc_img = Linear(2C, 1) with xavier_uniform_ weight, zero bias.
    fan_in, fan_out = 2 * c, 1
    bound = (6.0 / (fan_in + fan_out)) ** 0.5
    w = jax.random.uniform(key, (1, 2 * c), jnp.float32, -bound, bound)
    b = jnp.zeros((1,), jnp.float32)
    return w, b


def _reference(x, grid_img_features, weight, bias):
    g_mean = jnp.mean(grid_img_features, axis=0, keepdims=True)
    t, b, c = x.shape
    g = jnp.broadcast_to(g_mean, (t, b, c))
    merge = jnp.concatenate([x, g], axis=-1)
    gate = jax.nn.sigmoid(merge @ weight.T + bias)
    return gate * g, gate


if __name__ == "__main__":
    key = jax.random.PRNGKey(0)
    k1, k2, k3 = jax.random.split(key, 3)

    T, B, Tg, C = 8, 2, 5, 128
    x = jax.random.normal(k1, (T, B, C), jnp.float32)
    grid_img = jax.random.normal(k2, (Tg, B, C), jnp.float32)
    weight, bias = _init_params(k3, C)

    img, gate = jax.jit(gating_mechanism)(x, grid_img, weight, bias)
    jax.block_until_ready((img, gate))

    img_ref, gate_ref = _reference(x, grid_img, weight, bias)
    assert img.shape == (T, B, C) and gate.shape == (T, B, 1)
    assert jnp.allclose(img, img_ref, atol=1e-5, rtol=1e-5)
    assert jnp.allclose(gate, gate_ref, atol=1e-5, rtol=1e-5)

    print("KERNEL_OK")
</pallas_src>

<mosaic_0001>
module attributes {stable_mosaic.version = 11 : i64} {
  func.func @_gating_kernel(%arg0: i32, %arg1: memref<8x2x128xf32, #tpu.memory_space<vmem>>, %arg2: memref<2x128xf32, #tpu.memory_space<vmem>>, %arg3: memref<1x128xf32, #tpu.memory_space<vmem>>, %arg4: memref<2x1xf32, #tpu.memory_space<vmem>>, %arg5: memref<8x2x128xf32, #tpu.memory_space<vmem>>, %arg6: memref<8x2x1xf32, #tpu.memory_space<vmem>>) attributes {dimension_semantics = [#tpu.dimension_semantics<parallel>], iteration_bounds = array<i64: 1>, scalar_prefetch = 0 : i64, scratch_operands = 0 : i64, tpu.core_type = #tpu.core_type<tc>, window_params = [{transform_indices = @transform_0, window_bounds = array<i64: 8, 2, 128>}, {pipeline_mode = #tpu.pipeline_mode<synchronous>, transform_indices = @transform_1, window_bounds = array<i64: 2, 128>}, {pipeline_mode = #tpu.pipeline_mode<synchronous>, transform_indices = @transform_2, window_bounds = array<i64: 1, 128>}, {pipeline_mode = #tpu.pipeline_mode<synchronous>, transform_indices = @transform_3, window_bounds = array<i64: 2, 1>}, {transform_indices = @transform_4, window_bounds = array<i64: 8, 2, 128>}, {transform_indices = @transform_5, window_bounds = array<i64: 8, 2, 1>}]} {
    %c0 = arith.constant 0 : index
    %c0_0 = arith.constant 0 : index
    %c0_1 = arith.constant 0 : index
    %0 = vector.load %arg1[%c0, %c0_0, %c0_1] : memref<8x2x128xf32, #tpu.memory_space<vmem>>, vector<8x2x128xf32>
    %c0_2 = arith.constant 0 : index
    %c0_3 = arith.constant 0 : index
    %1 = vector.load %arg2[%c0_2, %c0_3] : memref<2x128xf32, #tpu.memory_space<vmem>>, vector<2x128xf32>
    %c0_4 = arith.constant 0 : index
    %c0_5 = arith.constant 0 : index
    %2 = vector.load %arg3[%c0_4, %c0_5] : memref<1x128xf32, #tpu.memory_space<vmem>>, vector<1x128xf32>
    %c0_6 = arith.constant 0 : index
    %c0_7 = arith.constant 0 : index
    %3 = vector.load %arg4[%c0_6, %c0_7] : memref<2x1xf32, #tpu.memory_space<vmem>>, vector<2x1xf32>
    %4 = vector.shape_cast %2 : vector<1x128xf32> to vector<1x1x128xf32>
    %5 = vector.broadcast %4 : vector<1x1x128xf32> to vector<8x2x128xf32>
    %6 = arith.mulf %0, %5 : vector<8x2x128xf32>
    %cst = arith.constant dense<0.000000e+00> : vector<8x2xf32>
    %7 = vector.multi_reduction <add>, %6, %cst [2] : vector<8x2x128xf32> to vector<8x2xf32>
    %8 = vector.shape_cast %7 : vector<8x2xf32> to vector<8x2x1xf32>
    %9 = vector.shape_cast %3 : vector<2x1xf32> to vector<1x2x1xf32>
    %10 = vector.broadcast %9 : vector<1x2x1xf32> to vector<8x2x1xf32>
    %11 = arith.addf %8, %10 : vector<8x2x1xf32>
    %12 = arith.negf %11 : vector<8x2x1xf32>
    %13 = math.exp %12 : vector<8x2x1xf32>
    %cst_8 = arith.constant 1.000000e+00 : f32
    %14 = vector.broadcast %cst_8 : f32 to vector<8x2x1xf32>
    %15 = arith.addf %14, %13 : vector<8x2x1xf32>
    %16 = arith.divf %14, %15 : vector<8x2x1xf32>
    %c0_9 = arith.constant 0 : index
    %c0_10 = arith.constant 0 : index
    %c0_11 = arith.constant 0 : index
    %17 = vector.load %arg6[%c0_9, %c0_10, %c0_11] : memref<8x2x1xf32, #tpu.memory_space<vmem>>, vector<8x2x1xf32>
    tpu.vector_store %arg6[%c0_9, %c0_10, %c0_11], %16 {strides = array<i32>} : memref<8x2x1xf32, #tpu.memory_space<vmem>>, vector<8x2x1xf32>,
    %18 = vector.shape_cast %1 : vector<2x128xf32> to vector<1x2x128xf32>
    %19 = vector.broadcast %16 : vector<8x2x1xf32> to vector<8x2x128xf32>
    %20 = vector.broadcast %18 : vector<1x2x128xf32> to vector<8x2x128xf32>
    %21 = arith.mulf %19, %20 : vector<8x2x128xf32>
    %c0_12 = arith.constant 0 : index
    %c0_13 = arith.constant 0 : index
    %c0_14 = arith.constant 0 : index
    %22 = vector.load %arg5[%c0_12, %c0_13, %c0_14] : memref<8x2x128xf32, #tpu.memory_space<vmem>>, vector<8x2x128xf32>
    tpu.vector_store %arg5[%c0_12, %c0_13, %c0_14], %21 {strides = array<i32>} : memref<8x2x128xf32, #tpu.memory_space<vmem>>, vector<8x2x128xf32>,
    return
  }
  func.func @transform_0(%arg0: i32) -> (i32, i32, i32) {
    %c0_i32 = arith.constant 0 : i32
    %c0_i32_0 = arith.constant 0 : i32
    %c0_i32_1 = arith.constant 0 : i32
    return %arg0, %c0_i32, %c0_i32_0 : i32, i32, i32
  }
  func.func @transform_1(%arg0: i32) -> (i32, i32) {
    %c0_i32 = arith.constant 0 : i32
    %c0_i32_0 = arith.constant 0 : i32
    %c0_i32_1 = arith.constant 0 : i32
    return %c0_i32, %c0_i32_0 : i32, i32
  }
  func.func @transform_2(%arg0: i32) -> (i32, i32) {
    %c0_i32 = arith.constant 0 : i32
    %c0_i32_0 = arith.constant 0 : i32
    %c0_i32_1 = arith.constant 0 : i32
    return %c0_i32, %c0_i32_0 : i32, i32
  }
  func.func @transform_3(%arg0: i32) -> (i32, i32) {
    %c0_i32 = arith.constant 0 : i32
    %c0_i32_0 = arith.constant 0 : i32
    %c0_i32_1 = arith.constant 0 : i32
    return %c0_i32, %c0_i32_0 : i32, i32
  }
  func.func @transform_4(%arg0: i32) -> (i32, i32, i32) {
    %c0_i32 = arith.constant 0 : i32
    %c0_i32_0 = arith.constant 0 : i32
    %c0_i32_1 = arith.constant 0 : i32
    return %arg0, %c0_i32, %c0_i32_0 : i32, i32, i32
  }
  func.func @transform_5(%arg0: i32) -> (i32, i32, i32) {
    %c0_i32 = arith.constant 0 : i32
    %c0_i32_0 = arith.constant 0 : i32
    %c0_i32_1 = arith.constant 0 : i32
    return %arg0, %c0_i32, %c0_i32_0 : i32, i32, i32
  }
}

</mosaic_0001>

<bundles_post_ra>
// kernel: gating_mechanism.1
= control target key start
LH: loop header
LB: loop body
LE: loop exit
PB: predicated region body
PF: predicated region fallthrough
CT: control target
= control target key end

     0   :  { %vm45_vm0 = vcmask 1041408   ;;  %s401_s0 = inlined_call_operand.vmem [shape: f32[8,2,128], index: 0, kind: input, shape index: {}]   ;;  %s402_s1 = inlined_call_operand.vmem [shape: f32[2,128], index: 1, kind: input, shape index: {}]   ;;  %s403_s2 = inlined_call_operand.vmem [shape: f32[1,128], index: 2, kind: input, shape index: {}]   ;;  %s404_s3 = inlined_call_operand.vmem [shape: f32[2,1], index: 3, kind: input, shape index: {}]   ;;  %s405_s4 = inlined_call_operand.hbm [shape: f32[8,2,128], index: 4, kind: output, shape index: {0}]   ;;  %s406_s5 = inlined_call_operand.vmem [shape: f32[8,2,1], index: 5, kind: output, shape index: {1}]  }
   0x1   :  { %v20_v0 = vld [vmem:[%s401_s0] sm:$0x3]  ;;  %v21_v3 = vld [vmem:[%s401_s0 + $0x2] sm:$0x3]  ;;  %v22_v4 = vld [vmem:[%s401_s0 + $0x4] sm:$0x3] }
   0x2   :  { %v211_v1 = vld [vmem:[%s403_s2] ss:$0 sm:$0xff]  ;;  %v23_v5 = vld [vmem:[%s401_s0 + $0x6] sm:$0x3]  ;;  %v24_v9 = vld [vmem:[%s401_s0 + $0x8] sm:$0x3] }
   0x3   :  { %v37_v2 = vmul.f32 %v211_v1, %v20_v0  ;;  %v38_v6 = vmul.f32 %v211_v1, %v21_v3  ;;  %v39_v7 = vmul.f32 %v211_v1, %v22_v4  ;;  %v40_v8 = vmul.f32 %v211_v1, %v23_v5  ;;  %v25_v11 = vld [vmem:[%s401_s0 + $0xa] sm:$0x3] }
   0x5   :  { %v46_v10 = vsel %vm45_vm0, %v37_v2, 0.0  ;;  %v52_v12 = vsel %vm45_vm0, %v39_v7, 0.0 }
   0x6   :  { %47 = vadd.xlane.f32.xlu0 %v46_v10 }
   0x7   :  { %11 = vsyncpa [#allocation3], 0  ;;  %v49_v13 = vsel %vm45_vm0, %v38_v6, 0.0  ;;  %53 = vadd.xlane.f32.xlu1 %v52_v12  ;;  %v41_v14 = vmul.f32 %v211_v1, %v24_v9  ;;  %v55_v15 = vsel %vm45_vm0, %v40_v8, 0.0  ;;  %v42_v16 = vmul.f32 %v211_v1, %v25_v11  ;;  %v26_v17 = vld [vmem:[%s401_s0 + $0xc] sm:$0x3] }
   0x8   :  { %v27_v18 = vld [vmem:[%s401_s0 + $0xe] sm:$0x3]  ;;  %v43_v20 = vmul.f32 %v211_v1, %v26_v17  ;;  %v282_v25 = vmov 0   ;;  %v30_v26 = vld [vmem:[%s404_s3] sm:$0x3]  ;;  %vm126_vm1 = vcmask 1024  }
   0x9   :  { %v58_v19 = vsel %vm45_vm0, %v41_v14, 0.0  ;;  %v61_v21 = vsel %vm45_vm0, %v42_v16, 0.0  ;;  %v44_v22 = vmul.f32 %v211_v1, %v27_v18  ;;  %224 = vset.pattern.permute.xlu0 %v282_v25  ;;  %225 = vset.pattern.permute.xlu1 %v282_v25  ;;  %v28_v11 = vld [vmem:[%s402_s1] sm:$0x3]  ;;  %s283_s1 = smov [#allocation2]  }
   0xa   :  { %50 = vadd.xlane.f32.xlu0 %v49_v13  ;;  %v64_v23 = vsel %vm45_vm0, %v43_v20, 0.0 }
   0xb   :  { %56 = vadd.xlane.f32.xlu1 %v55_v15  ;;  %v67_v24 = vsel %vm45_vm0, %v44_v22, 0.0 }
   0xe   :  { %59 = vadd.xlane.f32.xlu0 %v58_v19 }
   0xf   :  { %62 = vadd.xlane.f32.xlu1 %v61_v21 }
  0x12   :  { %65 = vadd.xlane.f32.xlu0 %v64_v23 }
  0x13   :  { %68 = vadd.xlane.f32.xlu1 %v67_v24 }
  0x93   :  { %v48_v27 = vpop.xlane.xlu0 %47 }
  0x94   :  { %v70_v28 = vadd.f32 %v48_v27, %v30_v26  ;;  %v54_v29 = vpop.xlane.xlu1 %53 }
  0x95   :  { %v72_v30 = vadd.f32 %v54_v29, %v30_v26 }
  0x96   :  { %v212_v31 = vmul.f32 -1.442695, %v70_v28 }
  0x97   :  { %v51_v32 = vpop.xlane.xlu0 %50  ;;  %v214_v33 = vmul.f32 -1.442695, %v72_v30 }
  0x98   :  { %226 = vpow2.f32 %v212_v31  ;;  %v71_v34 = vadd.f32 %v51_v32, %v30_v26  ;;  %v57_v35 = vpop.xlane.xlu1 %56 }
  0x99   :  { %228 = vpow2.f32 %v214_v33  ;;  %v73_v36 = vadd.f32 %v57_v35, %v30_v26 }
  0x9a   :  { %v213_v37 = vmul.f32 -1.442695, %v71_v34 }
  0x9b   :  { %v215_v38 = vmul.f32 -1.442695, %v73_v36  ;;  %v60_v39 = vpop.xlane.xlu0 %59 }
  0x9c   :  { %230 = vpow2.f32 %v213_v37  ;;  %v74_v40 = vadd.f32 %v60_v39, %v30_v26  ;;  %v63_v41 = vpop.xlane.xlu1 %62 }
  0x9d   :  { %232 = vpow2.f32 %v215_v38  ;;  %v75_v42 = vadd.f32 %v63_v41, %v30_v26 }
  0x9e   :  { %v216_v43 = vmul.f32 -1.442695, %v74_v40 }
  0x9f   :  { %v217_v44 = vmul.f32 -1.442695, %v75_v42  ;;  %v66_v45 = vpop.xlane.xlu0 %65 }
  0xa0   :  { %234 = vpow2.f32 %v216_v43  ;;  %v76_v46 = vadd.f32 %v66_v45, %v30_v26  ;;  %v69_v47 = vpop.xlane.xlu1 %68 }
  0xa1   :  { %236 = vpow2.f32 %v217_v44  ;;  %v77_v48 = vadd.f32 %v69_v47, %v30_v26 }
  0xa2   :  { %v227_v49 = vpop.eup %226  ;;  %v218_v50 = vmul.f32 -1.442695, %v76_v46 }
  0xa3   :  { %v229_v51 = vpop.eup %228  ;;  %v102_v52 = vadd.f32 1.0, %v227_v49  ;;  %v219_v53 = vmul.f32 -1.442695, %v77_v48 }
  0xa4   :  { %v104_v54 = vadd.f32 1.0, %v229_v51  ;;  %238 = vpow2.f32 %v218_v50 }
  0xa5   :  { %240 = vrcp.f32 %v102_v52 }
  0xa6   :  { %v231_v55 = vpop.eup %230  ;;  %242 = vrcp.f32 %v104_v54 }
  0xa7   :  { %v233_v56 = vpop.eup %232  ;;  %v103_v57 = vadd.f32 1.0, %v231_v55  ;;  %244 = vpow2.f32 %v219_v53 }
  0xa8   :  { %v105_v58 = vadd.f32 1.0, %v233_v56 }
  0xa9   :  { %246 = vrcp.f32 %v103_v57 }
  0xaa   :  { %v235_v59 = vpop.eup %234  ;;  %248 = vrcp.f32 %v105_v58 }
  0xab   :  { %v237_v60 = vpop.eup %236  ;;  %v106_v61 = vadd.f32 1.0, %v235_v59 }
  0xac   :  { %v107_v62 = vadd.f32 1.0, %v237_v60 }
  0xad   :  { %250 = vrcp.f32 %v106_v61 }
  0xae   :  { %v239_v63 = vpop.eup %238  ;;  %252 = vrcp.f32 %v107_v62 }
  0xaf   :  { %v241_v0 = vpop.eup %240  ;;  %v108_v1 = vadd.f32 1.0, %v239_v63 }
  0xb0   :  { %v243_v2 = vpop.eup %242  ;;  %127 = vst.msk [vmem:[%s406_s5] sm:$0x3] %vm126_vm1, %v241_v0  ;;  %137 = vperm.xlu0 %224, %v241_v0  }
  0xb1   :  { %v245_v3 = vpop.eup %244  ;;  %129 = vst.msk [vmem:[%s406_s5 + $0x4] sm:$0x3] %vm126_vm1, %v243_v2  ;;  %254 = vrcp.f32 %v108_v1 }
  0xb2   :  { %v109_v4 = vadd.f32 1.0, %v245_v3 }
  0xb3   :  { %v247_v5 = vpop.eup %246 }
  0xb4   :  { %v249_v6 = vpop.eup %248  ;;  %128 = vst.msk [vmem:[%s406_s5 + $0x2] sm:$0x3] %vm126_vm1, %v247_v5  ;;  %256 = vrcp.f32 %v109_v4  ;;  %142 = vperm.xlu1 %225, %v247_v5  }
  0xb5   :  { %130 = vst.msk [vmem:[%s406_s5 + $0x6] sm:$0x3] %vm126_vm1, %v249_v6 }
  0xb7   :  { %v251_v7 = vpop.eup %250 }
  0xb8   :  { %v253_v8 = vpop.eup %252  ;;  %131 = vst.msk [vmem:[%s406_s5 + $0x8] sm:$0x3] %vm126_vm1, %v251_v7  ;;  %147 = vperm.xlu1 %225, %v243_v2  }
  0xb9   :  { %132 = vst.msk [vmem:[%s406_s5 + $0xa] sm:$0x3] %vm126_vm1, %v253_v8 }
  0xbb   :  { %v255_v9 = vpop.eup %254 }
  0xbc   :  { %133 = vst.msk [vmem:[%s406_s5 + $0xc] sm:$0x3] %vm126_vm1, %v255_v9  ;;  %152 = vperm.xlu1 %225, %v249_v6  }
  0xbe   :  { %v257_v10 = vpop.eup %256 }
  0xbf   :  { %134 = vst.msk [vmem:[%s406_s5 + $0xe] sm:$0x3] %vm126_vm1, %v257_v10  ;;  %s196_s5 = sshll.u32 %s283_s1, 4  ;;  %s197_s5 = int_to_ptr.vmem [resolvable:$true] %s196_s5 }
  0xc0   :  { %157 = vperm.xlu1 %225, %v251_v7   ;;  %s258_s28 = scalar_lea.vmem %s197_s5, 256  ;;  %p263_p1 = scmp.lt.s32.totalorder %s197_s5, %s197_s5 }
  0xc1   :  { %p259_p0 = scmp.ne.s32.totalorder %s197_s5, %s258_s28  ;;  %p264_p2 = scmp.lt.s32.totalorder %s258_s28, %s258_s28 }
  0xc3   :  { %p265_p3 = por %p264_p2, %p263_p1 }
  0xc4   :  { %162 = vperm.xlu1 %225, %v253_v8  }
  0xc5   :  { %p266_p4 = pnand %p265_p3, %p259_p0 }
  0xc8   :  { %167 = vperm.xlu1 %225, %v255_v9  }
  0xcc   :  { %172 = vperm.xlu1 %225, %v257_v10  }
 0x12f   :  { %v138_v12 = vpop.permute.xlu0 %137 }
 0x130   :  { %v175_v13 = vmul.f32 %v138_v12, %v28_v11 }
 0x132   :  { %183 = vst [vmem:[#allocation2] sm:$0x3] %v175_v13 }
 0x133   :  { %v143_v14 = vpop.permute.xlu1 %142 }
 0x134   :  { %v176_v15 = vmul.f32 %v143_v14, %v28_v11 }
 0x136   :  { %184 = vst [vmem:[#allocation2 + $0x2] sm:$0x3] %v176_v15 }
 0x137   :  { %v148_v16 = vpop.permute.xlu1 %147 }
 0x138   :  { %v177_v17 = vmul.f32 %v148_v16, %v28_v11 }
 0x13a   :  { %185 = vst [vmem:[#allocation2 + $0x4] sm:$0x3] %v177_v17 }
 0x13b   :  { %v153_v18 = vpop.permute.xlu1 %152 }
 0x13c   :  { %v178_v19 = vmul.f32 %v153_v18, %v28_v11 }
 0x13e   :  { %186 = vst [vmem:[#allocation2 + $0x6] sm:$0x3] %v178_v19 }
 0x13f   :  { %v158_v20 = vpop.permute.xlu1 %157 }
 0x140   :  { %v179_v21 = vmul.f32 %v158_v20, %v28_v11 }
 0x142   :  { %187 = vst [vmem:[#allocation2 + $0x8] sm:$0x3] %v179_v21 }
 0x143   :  { %v163_v22 = vpop.permute.xlu1 %162 }
 0x144   :  { %v180_v23 = vmul.f32 %v163_v22, %v28_v11 }
 0x146   :  { %188 = vst [vmem:[#allocation2 + $0xa] sm:$0x3] %v180_v23 }
 0x147   :  { %v168_v24 = vpop.permute.xlu1 %167 }
 0x148   :  { %v181_v25 = vmul.f32 %v168_v24, %v28_v11 }
 0x14a   :  { %189 = vst [vmem:[#allocation2 + $0xc] sm:$0x3] %v181_v25 }
 0x14b   :  { %v173_v26 = vpop.permute.xlu1 %172 }
 0x14c   :  { %v182_v27 = vmul.f32 %v173_v26, %v28_v11 }
 0x14e   :  { %190 = vst [vmem:[#allocation2 + $0xe] sm:$0x3] %v182_v27 }
 0x14f   :  { %269 = shalt.err (!%p266_p4)
}
 0x150   :  { %s270_s30 = scalar_lea.hbm %s405_s4, 256 }
 0x151   :  { %p271_p5 = scmp.ne.s32.totalorder %s405_s4, %s270_s30  ;;  %p274_p6 = scmp.lt.u32.totalorder %s270_s30, %s405_s4 }
 0x153   :  { %p276_p7 = pnand %p274_p6, %p271_p5 }
 0x155   :  { %279 = shalt.err (!%p276_p7)
}
 0x156   :  { %s284_s0 = smov 32   ;;  %s285_s10 = smov 2  }
 0x157   :  { %202 = dma.vmem_to_hbm [thread:$0]  %s197_s5, 256, %s405_s4, [#allocation3], %s284_s0, %s284_s0, %s285_s10  }
 0x158   :  { %280 = dma.done.wait [#allocation3], 256  }
 0x159   :  { %281 = vsyncadd [#allocation3], 4294967040 }
 0x15a   :  { %210 = vsyncpa [#allocation3], 1 }

</bundles_post_ra>
